<compile_context>
chip_gen: v7x
topology: tpu7x:2x2x1
jax: 0.10.0
libtpu: 0.0.40
codegen_flags: <defaults>
</compile_context>

<pallas_src>
import functools
import math

import jax
import jax.numpy as jnp
from jax.experimental import pallas as pl
from jax.experimental.pallas import tpu as pltpu


def _get_slopes(heads):
    """Identical to Alibi._get_slopes (pure Python, deterministic)."""

    def get_slopes_power_of_2(n):
        start = 2 ** (-2 ** (-(math.log2(n) - 3)))
        ratio = start
        return [start * ratio ** i for i in range(n)]

    if math.log2(heads).is_integer():
        return get_slopes_power_of_2(heads)
    closest_power_of_2 = 2 ** math.floor(math.log2(heads))
    return (
        get_slopes_power_of_2(closest_power_of_2)
        + get_slopes_power_of_2(2 * closest_power_of_2)[0::2][: heads - closest_power_of_2]
    )


def _round_up(x: int, m: int) -> int:
    return ((x + m - 1) // m) * m


def _round_down(x: int, m: int) -> int:
    return (x // m) * m


def _alibi_kernel(slopes_ref, out_ref, *, tile_j):
    # slopes_ref: (heads, 1) f32 in VMEM (same block every grid step).
    # out_ref:    (heads, TILE_J) in VMEM; last (partial) block is clipped by
    #             Pallas on writeback, so no padding lanes hit HBM beyond
    #             round_up(j, 128).
    jb = pl.program_id(0)
    h, tj = out_ref.shape

    # Global position along lanes for this tile: jb*TILE_J + [0..TILE_J).
    # Integer iota + integer offset, converted once (exact), then a single
    # broadcast-multiply on the VPU — trivially hidden under the output DMA.
    pos_i = jax.lax.broadcasted_iota(jnp.int32, (h, tj), 1) + jb * tile_j
    pos = pos_i.astype(jnp.float32)

    out_ref[...] = (slopes_ref[...] * pos).astype(out_ref.dtype)


def alibi_bias(heads: int, j: int, *, dtype=jnp.float32,
               vmem_budget_bytes: int = 8 * 1024 * 1024) -> jax.Array:
    """Returns the ALiBi bias of shape (heads, 1, j) in `dtype` (default f32)."""
    # Pad j to a lane multiple only; heads stays unpadded (block == full dim).
    j_pad = _round_up(j, 128)
    itemsize = jnp.dtype(dtype).itemsize

    # Largest tile that keeps double-buffered output blocks within a budget
    # that is safe on every generation (v5e 16 MiB scoped default, v7x 32 MiB
    # scoped / 64 MiB physical).
    max_tile = max(128, _round_down(vmem_budget_bytes // (2 * heads * itemsize), 128))

    if j_pad >= 256:
        # Prefer >= 2 (roughly equal, 128-multiple) blocks so the "parallel"
        # grid axis actually splits the write stream across v7x's two TCs.
        half = _round_up(pl.cdiv(j_pad, 2), 128)
        tile_j = min(max_tile, half)
    else:
        tile_j = j_pad  # single 128-lane tile

    grid_j = pl.cdiv(j_pad, tile_j)

    slopes = jnp.asarray(_get_slopes(heads), dtype=jnp.float32).reshape(heads, 1)

    kernel = functools.partial(_alibi_kernel, tile_j=tile_j)

    out = pl.pallas_call(
        kernel,
        out_shape=jax.ShapeDtypeStruct((heads, j_pad), dtype),
        grid_spec=pltpu.PrefetchScalarGridSpec(
            num_scalar_prefetch=0,
            grid=(grid_j,),
            in_specs=[pl.BlockSpec((heads, 1), lambda jb: (0, 0))],
            out_specs=pl.BlockSpec((heads, tile_j), lambda jb: (0, jb)),
        ),
        compiler_params=pltpu.CompilerParams(
            dimension_semantics=("parallel",),
        ),
    )(slopes)

    # Match the PyTorch rearrange: (h, 1, j). Slice only the (<=127) lane pad.
    if j_pad != j:
        out = out[:, :j]
    return out.reshape(heads, 1, j)


if __name__ == "__main__":
    # Deterministic small example consistent with the module's forward(i, j).
    # (PRNGKey only to satisfy the deterministic-setup convention; the ALiBi
    #  bias has no random parameters.)
    _ = jax.random.PRNGKey(0)

    def _reference(heads, j):
        slopes_ref = jnp.asarray(_get_slopes(heads), dtype=jnp.float32).reshape(heads, 1, 1)
        return jnp.arange(j, dtype=jnp.float32).reshape(1, 1, j) * slopes_ref

    # Case 1: power-of-2 heads, small j (single 128-lane tile, grid_j == 1).
    heads, i, j = 8, 16, 16  # `i` is unused by the reference forward as well
    bias = jax.block_until_ready(alibi_bias(heads, j))
    assert bias.shape == (heads, 1, j)
    assert bias.dtype == jnp.float32
    assert jnp.allclose(bias, _reference(heads, j), atol=1e-6, rtol=1e-6)

    # Case 2: non-power-of-2 heads and ragged j (unpadded heads, partial last
    # block on the lane axis, grid_j == 2).
    heads2, j2 = 12, 300
    bias2 = jax.block_until_ready(alibi_bias(heads2, j2))
    assert bias2.shape == (heads2, 1, j2)
    assert jnp.allclose(bias2, _reference(heads2, j2), atol=1e-6, rtol=1e-6)

    # Case 3: larger j exercising the big-tile / multi-step path.
    heads3, j3 = 8, 4096
    bias3 = jax.block_until_ready(alibi_bias(heads3, j3))
    assert bias3.shape == (heads3, 1, j3)
    assert jnp.allclose(bias3, _reference(heads3, j3), atol=1e-6, rtol=1e-6)

    print("KERNEL_OK")
</pallas_src>

<mosaic_0001>
module attributes {stable_mosaic.version = 11 : i64} {
  func.func @_alibi_kernel(%arg0: i32, %arg1: memref<8x1xf32, #tpu.memory_space<vmem>>, %arg2: memref<8x128xf32, #tpu.memory_space<vmem>>) attributes {dimension_semantics = [#tpu.dimension_semantics<parallel>], iteration_bounds = array<i64: 1>, scalar_prefetch = 0 : i64, scratch_operands = 0 : i64, tpu.core_type = #tpu.core_type<tc>, window_params = [{pipeline_mode = #tpu.pipeline_mode<synchronous>, transform_indices = @transform_0, window_bounds = array<i64: 8, 1>}, {transform_indices = @transform_1, window_bounds = array<i64: 8, 128>}]} {
    %0 = tpu.iota {dimensions = array<i32: 1>} : vector<8x128xi32>
    %c128_i32 = arith.constant 128 : i32
    %1 = arith.muli %arg0, %c128_i32 : i32
    %2 = vector.broadcast %1 : i32 to vector<8x128xi32>
    %3 = arith.addi %0, %2 : vector<8x128xi32>
    %4 = arith.sitofp %3 : vector<8x128xi32> to vector<8x128xf32>
    %c0 = arith.constant 0 : index
    %c0_0 = arith.constant 0 : index
    %5 = vector.load %arg1[%c0, %c0_0] : memref<8x1xf32, #tpu.memory_space<vmem>>, vector<8x1xf32>
    %6 = vector.broadcast %5 : vector<8x1xf32> to vector<8x128xf32>
    %7 = arith.mulf %6, %4 : vector<8x128xf32>
    %c0_1 = arith.constant 0 : index
    %c0_2 = arith.constant 0 : index
    %8 = vector.load %arg2[%c0_1, %c0_2] : memref<8x128xf32, #tpu.memory_space<vmem>>, vector<8x128xf32>
    tpu.vector_store %arg2[%c0_1, %c0_2], %7 {strides = array<i32>} : memref<8x128xf32, #tpu.memory_space<vmem>>, vector<8x128xf32>,
    return
  }
  func.func @transform_0(%arg0: i32) -> (i32, i32) {
    %c0_i32 = arith.constant 0 : i32
    %c0_i32_0 = arith.constant 0 : i32
    %c0_i32_1 = arith.constant 0 : i32
    return %c0_i32, %c0_i32_0 : i32, i32
  }
  func.func @transform_1(%arg0: i32) -> (i32, i32) {
    %c0_i32 = arith.constant 0 : i32
    %c0_i32_0 = arith.constant 0 : i32
    return %c0_i32, %arg0 : i32, i32
  }
}

</mosaic_0001>

<bundles_post_ra>
// kernel: tpu_custom_call.1
= control target key start
LH: loop header
LB: loop body
LE: loop exit
PB: predicated region body
PF: predicated region fallthrough
CT: control target
= control target key end

     0   :  { %s91_s0 = inlined_call_operand.vmem [shape: f32[8,1], index: 0, kind: input, shape index: {}]   ;;  %s92_s1 = inlined_call_operand.hbm [shape: f32[8,128], index: 1, kind: output, shape index: {}]  }
   0x1   :  { %v15_v0 = vld [vmem:[%s91_s0] sm:$0xff] }
   0x2   :  { %6 = vsyncpa [#allocation3], 0  ;;  %v64_v1 = vmov 0   ;;  %v9_v2 = vlaneseq  ;;  %s65_s8 = smov [#allocation2]  }
   0x3   :  { %39 = vset.pattern.permute.xlu0 %v64_v1  ;;  %s29_s9 = sshll.u32 %s65_s8, 4  ;;  %s30_s9 = int_to_ptr.vmem [resolvable:$true] %s29_s9 }
   0x4   :  { %18 = vperm.xlu0 %39, %v15_v0   ;;  %v10_v3 = vand.u32 127, %v9_v2  ;;  %s40_s10 = scalar_lea.vmem %s30_s9, 128  ;;  %p45_p1 = scmp.lt.s32.totalorder %s30_s9, %s30_s9 }
   0x5   :  { %p41_p0 = scmp.ne.s32.totalorder %s30_s9, %s40_s10  ;;  %p46_p2 = scmp.lt.s32.totalorder %s40_s10, %s40_s10 }
   0x6   :  { %v14_v4 = vcvt.s32.f32 %v10_v3 }
   0x7   :  { %p47_p3 = por %p46_p2, %p45_p1 }
   0x9   :  { %p48_p4 = pnand %p47_p3, %p41_p0 }
  0x83   :  { %v19_v5 = vpop.permute.xlu0 %18 }
  0x84   :  { %v21_v6 = vmul.f32 %v19_v5, %v14_v4 }
  0x86   :  { %22 = vst [vmem:[#allocation2] sm:$0xff] %v21_v6 }
  0x87   :  { %51 = shalt.err (!%p48_p4)
}
  0x88   :  { %s52_s12 = scalar_lea.hbm %s92_s1, 128 }
  0x89   :  { %p53_p5 = scmp.ne.s32.totalorder %s92_s1, %s52_s12  ;;  %p56_p6 = scmp.lt.u32.totalorder %s52_s12, %s92_s1 }
  0x8b   :  { %p58_p7 = pnand %p56_p6, %p53_p5 }
  0x8d   :  { %61 = shalt.err (!%p58_p7)
}
  0x8e   :  { %32 = dma.vmem_to_hbm [thread:$0]  %s30_s9, 128, %s92_s1, [#allocation3]  }
  0x8f   :  { %62 = dma.done.wait [#allocation3], 128  }
  0x90   :  { %63 = vsyncadd [#allocation3], 4294967168 }
  0x91   :  { %36 = vsyncpa [#allocation3], 1 }

</bundles_post_ra>
